<compile_context>
chip_gen: v7x
topology: tpu7x:2x2x1
jax: 0.10.0
libtpu: 0.0.40
codegen_flags: <defaults>
</compile_context>

<pallas_src>
import functools

import jax
import jax.numpy as jnp
from jax import lax
from jax.experimental import pallas as pl
from jax.experimental.pallas import tpu as pltpu

_MASK_VALUE = -1e30  # finite "minus infinity" for excluded logits


def _round_up(x, m):
    return (x + m - 1) // m * m


def _ntxent_kernel(q1_ref, q2_ref, k1_ref, k2_ref,        # inputs
                   out1_ref, out2_ref,                     # per-row losses
                   m1_ref, l1_ref, m2_ref, l2_ref,         # online-LSE scratch
                   *, inv_temp, use_cosine, valid_b, padded_b, mxu_dtype):
    """One (row-tile i, key-tile j) step of the NT-Xent loss.

    q1/k1 hold rows of zjs (first half of cat([zjs, zis])), q2/k2 rows of zis.
    For every real query row r:
        loss_r = logsumexp_{c != r}(sim[r, c] / T) - sim[r, partner(r)] / T
    computed with a flash-style online LSE over the key tiles.
    """
    i = pl.program_id(0)
    j = pl.program_id(1)
    last_j = pl.num_programs(1) - 1
    tm = q1_ref.shape[0]
    tn = k1_ref.shape[0]

    @pl.when(j == 0)
    def _init():
        m1_ref[...] = jnp.full(m1_ref.shape, -jnp.inf, dtype=m1_ref.dtype)
        l1_ref[...] = jnp.zeros(l1_ref.shape, dtype=l1_ref.dtype)
        m2_ref[...] = jnp.full(m2_ref.shape, -jnp.inf, dtype=m2_ref.dtype)
        l2_ref[...] = jnp.zeros(l2_ref.shape, dtype=l2_ref.dtype)

    def _prep(ref, scale):
        """L2-normalize (cosine) and fold `scale` in, then cast for the MXU."""
        x = ref[...].astype(jnp.float32)
        if use_cosine:
            nrm2 = jnp.sum(x * x, axis=-1, keepdims=True)
            # torch.nn.CosineSimilarity(eps=1e-8): per-row norm clamp (only
            # differs from torch's max(|x||y|, eps) for near-zero-norm rows).
            x = x * lax.rsqrt(jnp.maximum(nrm2, 1e-16))
        if scale != 1.0:
            x = x * scale
        return x.astype(mxu_dtype)

    q1 = _prep(q1_ref, 1.0)
    q2 = _prep(q2_ref, 1.0)
    k1 = _prep(k1_ref, inv_temp)          # 1/T folded into the key operand
    k2 = _prep(k2_ref, inv_temp)

    # Contract over the feature (last) dim of both operands: no transpose.
    dn = (((1,), (1,)), ((), ()))
    s11 = lax.dot_general(q1, k1, dimension_numbers=dn,
                          preferred_element_type=jnp.float32)
    s12 = lax.dot_general(q1, k2, dimension_numbers=dn,
                          preferred_element_type=jnp.float32)
    s21 = lax.dot_general(q2, k1, dimension_numbers=dn,
                          preferred_element_type=jnp.float32)
    s22 = lax.dot_general(q2, k2, dimension_numbers=dn,
                          preferred_element_type=jnp.float32)

    # Diagonal / padding exclusion via O(n) index vectors (no (n,n) iotas).
    row_g = i * tm + lax.broadcasted_iota(jnp.int32, (tm, 1), 0)   # global row
    col_g = j * tn + lax.broadcasted_iota(jnp.int32, (1, tn), 1)   # global col
    not_self = row_g != col_g                                      # (tm, tn)
    if padded_b > valid_b:
        col_valid = col_g < valid_b                                # (1, tn)
        mask_same_half = not_self & col_valid
        s11 = jnp.where(mask_same_half, s11, _MASK_VALUE)
        s22 = jnp.where(mask_same_half, s22, _MASK_VALUE)
        s12 = jnp.where(col_valid, s12, _MASK_VALUE)
        s21 = jnp.where(col_valid, s21, _MASK_VALUE)
    else:
        s11 = jnp.where(not_self, s11, _MASK_VALUE)
        s22 = jnp.where(not_self, s22, _MASK_VALUE)

    def _update(m_ref, l_ref, sa, sb):
        blk_max = jnp.maximum(jnp.max(sa, axis=-1, keepdims=True),
                              jnp.max(sb, axis=-1, keepdims=True))
        m_new = jnp.maximum(m_ref[...], blk_max)
        alpha = jnp.exp(m_ref[...] - m_new)
        l_ref[...] = (alpha * l_ref[...]
                      + jnp.sum(jnp.exp(sa - m_new), axis=-1, keepdims=True)
                      + jnp.sum(jnp.exp(sb - m_new), axis=-1, keepdims=True))
        m_ref[...] = m_new

    _update(m1_ref, l1_ref, s11, s12)
    _update(m2_ref, l2_ref, s21, s22)

    @pl.when(j == last_j)
    def _finalize():
        # Positive logit = direct paired-row dot of the two halves, using the
        # same bf16/scaled operands the MXU saw for the cross blocks.
        q1s = _prep(q1_ref, inv_temp).astype(jnp.float32)
        q2s = _prep(q2_ref, inv_temp).astype(jnp.float32)
        pos1 = jnp.sum(q1.astype(jnp.float32) * q2s, axis=-1, keepdims=True)
        pos2 = jnp.sum(q2.astype(jnp.float32) * q1s, axis=-1, keepdims=True)
        out1_ref[...] = jnp.log(l1_ref[...]) + m1_ref[...] - pos1
        out2_ref[...] = jnp.log(l2_ref[...]) + m2_ref[...] - pos2


def ntxent_loss(zis, zjs, *, temperature=0.5, use_cosine_similarity=True,
                row_tile=256, mxu_dtype=jnp.bfloat16):
    """JAX/Pallas equivalent of NTXentLoss.forward(zis, zjs, sz=batch)."""
    assert zis.shape == zjs.shape and zis.ndim == 2
    b, d = zis.shape

    # Tile sizes: rows padded to a multiple of 8 sublanes (256-wide tiles for
    # large batches -> good MXU fill on v6e/v7x, also a multiple of 128 for
    # v5e); features padded to a multiple of 128 lanes. Key tile == query tile.
    tm = min(_round_up(row_tile, 8), _round_up(b, 8))
    tn = tm
    b_pad = _round_up(b, tm)
    d_pad = _round_up(d, 128)
    # TODO(synk): additionally tile the feature (K) dimension for very large D.

    z1 = jnp.pad(zjs.astype(jnp.float32), ((0, b_pad - b), (0, d_pad - d)))
    z2 = jnp.pad(zis.astype(jnp.float32), ((0, b_pad - b), (0, d_pad - d)))

    grid = (b_pad // tm, b_pad // tn)

    kernel = functools.partial(
        _ntxent_kernel,
        inv_temp=float(1.0 / temperature),
        use_cosine=bool(use_cosine_similarity),
        valid_b=int(b),
        padded_b=int(b_pad),
        mxu_dtype=mxu_dtype,
    )

    # VMEM budget: double-buffered input tiles + MXU operand copies +
    # similarity blocks / exp temporaries, 2x headroom, capped well below
    # v7x's 64 MiB physical VMEM.
    vmem_bytes = (4 * 2 * tm * d_pad * 4      # f32 input tiles, double-buffered
                  + 4 * tm * d_pad * 2        # bf16 MXU operands
                  + 8 * tm * tn * 4           # sim blocks + exp temporaries
                  + 16 * tm * 4)              # scratch + per-row vectors
    vmem_limit = int(min(max(2 * vmem_bytes, 16 * 1024 * 1024),
                         48 * 1024 * 1024))

    out1, out2 = pl.pallas_call(
        kernel,
        out_shape=(jax.ShapeDtypeStruct((b_pad, 1), jnp.float32),
                   jax.ShapeDtypeStruct((b_pad, 1), jnp.float32)),
        grid_spec=pltpu.PrefetchScalarGridSpec(
            num_scalar_prefetch=0,
            grid=grid,
            in_specs=[
                pl.BlockSpec((tm, d_pad), lambda i, j: (i, 0)),   # q1: zjs rows
                pl.BlockSpec((tm, d_pad), lambda i, j: (i, 0)),   # q2: zis rows
                pl.BlockSpec((tn, d_pad), lambda i, j: (j, 0)),   # k1: zjs rows
                pl.BlockSpec((tn, d_pad), lambda i, j: (j, 0)),   # k2: zis rows
            ],
            out_specs=[
                pl.BlockSpec((tm, 1), lambda i, j: (i, 0)),
                pl.BlockSpec((tm, 1), lambda i, j: (i, 0)),
            ],
            scratch_shapes=[pltpu.VMEM((tm, 1), jnp.float32)] * 4,
        ),
        compiler_params=pltpu.CompilerParams(
            dimension_semantics=("parallel", "arbitrary"),
            vmem_limit_bytes=vmem_limit,
        ),
    )(z1, z2, z1, z2)

    # CrossEntropy(reduction='sum') over the 2B real rows, divided by 2B.
    return (jnp.sum(out1[:b, 0]) + jnp.sum(out2[:b, 0])) / (2 * b)


def _ntxent_reference(zis, zjs, temperature, use_cosine):
    """Pure-JAX f32 reference mirroring the PyTorch forward."""
    b = zis.shape[0]
    n = 2 * b
    reps = jnp.concatenate([zjs, zis], axis=0).astype(jnp.float32)
    sim = reps @ reps.T
    if use_cosine:
        norms = jnp.sqrt(jnp.sum(reps * reps, axis=-1, keepdims=True))
        sim = sim / jnp.maximum(norms * norms.T, 1e-8)
    sim = sim / temperature
    eye = jnp.eye(n, dtype=bool)
    masked = jnp.where(eye, -jnp.inf, sim)
    lse = jax.scipy.special.logsumexp(masked, axis=-1)
    idx = jnp.arange(n)
    pos = sim[idx, (idx + b) % n]
    return jnp.mean(lse - pos)


if __name__ == "__main__":
    key = jax.random.PRNGKey(0)
    k1, k2, k3, k4 = jax.random.split(key, 4)

    batch, hidden, temperature = 4, 32, 0.5
    zis = jax.random.normal(k1, (batch, hidden), dtype=jnp.float32)
    zjs = jax.random.normal(k2, (batch, hidden), dtype=jnp.float32)

    # 1) cosine-similarity variant (module default); bf16 MXU operands ->
    #    compare against the f32 reference with a matching tolerance.
    loss = jax.block_until_ready(
        ntxent_loss(zis, zjs, temperature=temperature,
                    use_cosine_similarity=True))
    ref = _ntxent_reference(zis, zjs, temperature, True)
    assert jnp.allclose(loss, ref, atol=3e-2, rtol=3e-2), (loss, ref)

    # 2) dot-product-similarity variant.
    loss_d = jax.block_until_ready(
        ntxent_loss(zis, zjs, temperature=temperature,
                    use_cosine_similarity=False))
    ref_d = _ntxent_reference(zis, zjs, temperature, False)
    assert jnp.allclose(loss_d, ref_d, atol=5e-1, rtol=5e-2), (loss_d, ref_d)

    # 3) multi-tile grid path (several row/key tiles + online-LSE carry).
    zis_m = jax.random.normal(k3, (24, 20), dtype=jnp.float32)
    zjs_m = jax.random.normal(k4, (24, 20), dtype=jnp.float32)
    loss_m = jax.block_until_ready(
        ntxent_loss(zis_m, zjs_m, temperature=temperature,
                    use_cosine_similarity=True, row_tile=8))
    ref_m = _ntxent_reference(zis_m, zjs_m, temperature, True)
    assert jnp.allclose(loss_m, ref_m, atol=3e-2, rtol=3e-2), (loss_m, ref_m)

    print("KERNEL_OK")
</pallas_src>

<mosaic_0001>
module attributes {stable_mosaic.version = 11 : i64} {
  func.func @_ntxent_kernel(%arg0: i32, %arg1: i32, %arg2: memref<8x128xf32, #tpu.memory_space<vmem>>, %arg3: memref<8x128xf32, #tpu.memory_space<vmem>>, %arg4: memref<8x128xf32, #tpu.memory_space<vmem>>, %arg5: memref<8x128xf32, #tpu.memory_space<vmem>>, %arg6: memref<8x1xf32, #tpu.memory_space<vmem>>, %arg7: memref<8x1xf32, #tpu.memory_space<vmem>>, %arg8: memref<8x1xf32, #tpu.memory_space<vmem>>, %arg9: memref<8x1xf32, #tpu.memory_space<vmem>>, %arg10: memref<8x1xf32, #tpu.memory_space<vmem>>, %arg11: memref<8x1xf32, #tpu.memory_space<vmem>>) attributes {dimension_semantics = [#tpu.dimension_semantics<parallel>, #tpu.dimension_semantics<arbitrary>], iteration_bounds = array<i64: 1, 1>, scalar_prefetch = 0 : i64, scratch_operands = 4 : i64, tpu.core_type = #tpu.core_type<tc>, window_params = [{transform_indices = @transform_0, window_bounds = array<i64: 8, 128>}, {transform_indices = @transform_1, window_bounds = array<i64: 8, 128>}, {transform_indices = @transform_2, window_bounds = array<i64: 8, 128>}, {transform_indices = @transform_3, window_bounds = array<i64: 8, 128>}, {transform_indices = @transform_4, window_bounds = array<i64: 8, 1>}, {transform_indices = @transform_5, window_bounds = array<i64: 8, 1>}]} {
    %c0_i32 = arith.constant 0 : i32
    %0 = arith.cmpi eq, %arg1, %c0_i32 : i32
    %1 = arith.extui %0 : i1 to i32
    %c0_i32_0 = arith.constant 0 : i32
    %2 = arith.cmpi ne, %1, %c0_i32_0 : i32
    scf.if %2 {
      %cst_56 = arith.constant 0xFF800000 : f32
      %133 = vector.broadcast %cst_56 : f32 to vector<8x1xf32>
      %c0_57 = arith.constant 0 : index
      %c0_58 = arith.constant 0 : index
      %134 = vector.load %arg8[%c0_57, %c0_58] : memref<8x1xf32, #tpu.memory_space<vmem>>, vector<8x1xf32>
      tpu.vector_store %arg8[%c0_57, %c0_58], %133 {strides = array<i32>} : memref<8x1xf32, #tpu.memory_space<vmem>>, vector<8x1xf32>,
      %cst_59 = arith.constant 0.000000e+00 : f32
      %135 = vector.broadcast %cst_59 : f32 to vector<8x1xf32>
      %c0_60 = arith.constant 0 : index
      %c0_61 = arith.constant 0 : index
      %136 = vector.load %arg9[%c0_60, %c0_61] : memref<8x1xf32, #tpu.memory_space<vmem>>, vector<8x1xf32>
      tpu.vector_store %arg9[%c0_60, %c0_61], %135 {strides = array<i32>} : memref<8x1xf32, #tpu.memory_space<vmem>>, vector<8x1xf32>,
      %cst_62 = arith.constant 0xFF800000 : f32
      %137 = vector.broadcast %cst_62 : f32 to vector<8x1xf32>
      %c0_63 = arith.constant 0 : index
      %c0_64 = arith.constant 0 : index
      %138 = vector.load %arg10[%c0_63, %c0_64] : memref<8x1xf32, #tpu.memory_space<vmem>>, vector<8x1xf32>
      tpu.vector_store %arg10[%c0_63, %c0_64], %137 {strides = array<i32>} : memref<8x1xf32, #tpu.memory_space<vmem>>, vector<8x1xf32>,
      %cst_65 = arith.constant 0.000000e+00 : f32
      %139 = vector.broadcast %cst_65 : f32 to vector<8x1xf32>
      %c0_66 = arith.constant 0 : index
      %c0_67 = arith.constant 0 : index
      %140 = vector.load %arg11[%c0_66, %c0_67] : memref<8x1xf32, #tpu.memory_space<vmem>>, vector<8x1xf32>
      tpu.vector_store %arg11[%c0_66, %c0_67], %139 {strides = array<i32>} : memref<8x1xf32, #tpu.memory_space<vmem>>, vector<8x1xf32>,
    } else {
    }
    %c0 = arith.constant 0 : index
    %c0_1 = arith.constant 0 : index
    %3 = vector.load %arg2[%c0, %c0_1] : memref<8x128xf32, #tpu.memory_space<vmem>>, vector<8x128xf32>
    %4 = arith.mulf %3, %3 : vector<8x128xf32>
    %cst = arith.constant dense<0.000000e+00> : vector<8xf32>
    %5 = vector.multi_reduction <add>, %4, %cst [1] : vector<8x128xf32> to vector<8xf32>
    %6 = vector.shape_cast %5 : vector<8xf32> to vector<8x1xf32>
    %cst_2 = arith.constant 1.000000e-16 : f32
    %7 = vector.broadcast %cst_2 : f32 to vector<8x1xf32>
    %8 = arith.maximumf %6, %7 : vector<8x1xf32>
    %9 = math.rsqrt %8 : vector<8x1xf32>
    %10 = vector.broadcast %9 : vector<8x1xf32> to vector<8x128xf32>
    %11 = arith.mulf %3, %10 : vector<8x128xf32>
    %12 = arith.truncf %11 : vector<8x128xf32> to vector<8x128xbf16>
    %c0_3 = arith.constant 0 : index
    %c0_4 = arith.constant 0 : index
    %13 = vector.load %arg3[%c0_3, %c0_4] : memref<8x128xf32, #tpu.memory_space<vmem>>, vector<8x128xf32>
    %14 = arith.mulf %13, %13 : vector<8x128xf32>
    %cst_5 = arith.constant dense<0.000000e+00> : vector<8xf32>
    %15 = vector.multi_reduction <add>, %14, %cst_5 [1] : vector<8x128xf32> to vector<8xf32>
    %16 = vector.shape_cast %15 : vector<8xf32> to vector<8x1xf32>
    %cst_6 = arith.constant 1.000000e-16 : f32
    %17 = vector.broadcast %cst_6 : f32 to vector<8x1xf32>
    %18 = arith.maximumf %16, %17 : vector<8x1xf32>
    %19 = math.rsqrt %18 : vector<8x1xf32>
    %20 = vector.broadcast %19 : vector<8x1xf32> to vector<8x128xf32>
    %21 = arith.mulf %13, %20 : vector<8x128xf32>
    %22 = arith.truncf %21 : vector<8x128xf32> to vector<8x128xbf16>
    %c0_7 = arith.constant 0 : index
    %c0_8 = arith.constant 0 : index
    %23 = vector.load %arg4[%c0_7, %c0_8] : memref<8x128xf32, #tpu.memory_space<vmem>>, vector<8x128xf32>
    %24 = arith.mulf %23, %23 : vector<8x128xf32>
    %cst_9 = arith.constant dense<0.000000e+00> : vector<8xf32>
    %25 = vector.multi_reduction <add>, %24, %cst_9 [1] : vector<8x128xf32> to vector<8xf32>
    %26 = vector.shape_cast %25 : vector<8xf32> to vector<8x1xf32>
    %cst_10 = arith.constant 1.000000e-16 : f32
    %27 = vector.broadcast %cst_10 : f32 to vector<8x1xf32>
    %28 = arith.maximumf %26, %27 : vector<8x1xf32>
    %29 = math.rsqrt %28 : vector<8x1xf32>
    %30 = vector.broadcast %29 : vector<8x1xf32> to vector<8x128xf32>
    %31 = arith.mulf %23, %30 : vector<8x128xf32>
    %cst_11 = arith.constant 2.000000e+00 : f32
    %32 = vector.broadcast %cst_11 : f32 to vector<8x128xf32>
    %33 = arith.mulf %31, %32 : vector<8x128xf32>
    %34 = arith.truncf %33 : vector<8x128xf32> to vector<8x128xbf16>
    %c0_12 = arith.constant 0 : index
    %c0_13 = arith.constant 0 : index
    %35 = vector.load %arg5[%c0_12, %c0_13] : memref<8x128xf32, #tpu.memory_space<vmem>>, vector<8x128xf32>
    %36 = arith.mulf %35, %35 : vector<8x128xf32>
    %cst_14 = arith.constant dense<0.000000e+00> : vector<8xf32>
    %37 = vector.multi_reduction <add>, %36, %cst_14 [1] : vector<8x128xf32> to vector<8xf32>
    %38 = vector.shape_cast %37 : vector<8xf32> to vector<8x1xf32>
    %cst_15 = arith.constant 1.000000e-16 : f32
    %39 = vector.broadcast %cst_15 : f32 to vector<8x1xf32>
    %40 = arith.maximumf %38, %39 : vector<8x1xf32>
    %41 = math.rsqrt %40 : vector<8x1xf32>
    %42 = vector.broadcast %41 : vector<8x1xf32> to vector<8x128xf32>
    %43 = arith.mulf %35, %42 : vector<8x128xf32>
    %cst_16 = arith.constant 2.000000e+00 : f32
    %44 = vector.broadcast %cst_16 : f32 to vector<8x128xf32>
    %45 = arith.mulf %43, %44 : vector<8x128xf32>
    %46 = arith.truncf %45 : vector<8x128xf32> to vector<8x128xbf16>
    %cst_17 = arith.constant dense<0.000000e+00> : vector<8x8xf32>
    %47 = tpu.matmul %12, %34, %cst_17 {dimension_numbers = #tpu.dot_dimension_numbers<[1], [1], [0], [0], [0, 0, 1, 0], [], []>} : vector<8x128xbf16>, vector<8x128xbf16>, vector<8x8xf32> -> vector<8x8xf32>
    %cst_18 = arith.constant dense<0.000000e+00> : vector<8x8xf32>
    %48 = tpu.matmul %12, %46, %cst_18 {dimension_numbers = #tpu.dot_dimension_numbers<[1], [1], [0], [0], [0, 0, 1, 0], [], []>} : vector<8x128xbf16>, vector<8x128xbf16>, vector<8x8xf32> -> vector<8x8xf32>
    %cst_19 = arith.constant dense<0.000000e+00> : vector<8x8xf32>
    %49 = tpu.matmul %22, %34, %cst_19 {dimension_numbers = #tpu.dot_dimension_numbers<[1], [1], [0], [0], [0, 0, 1, 0], [], []>} : vector<8x128xbf16>, vector<8x128xbf16>, vector<8x8xf32> -> vector<8x8xf32>
    %cst_20 = arith.constant dense<0.000000e+00> : vector<8x8xf32>
    %50 = tpu.matmul %22, %46, %cst_20 {dimension_numbers = #tpu.dot_dimension_numbers<[1], [1], [0], [0], [0, 0, 1, 0], [], []>} : vector<8x128xbf16>, vector<8x128xbf16>, vector<8x8xf32> -> vector<8x8xf32>
    %c8_i32 = arith.constant 8 : i32
    %51 = arith.muli %arg0, %c8_i32 : i32
    %52 = tpu.iota {dimensions = array<i32: 0>} : vector<8x1xi32>
    %53 = vector.broadcast %51 : i32 to vector<8x1xi32>
    %54 = arith.addi %53, %52 : vector<8x1xi32>
    %c8_i32_21 = arith.constant 8 : i32
    %55 = arith.muli %arg1, %c8_i32_21 : i32
    %56 = tpu.iota {dimensions = array<i32: 1>} : vector<1x8xi32>
    %57 = vector.broadcast %55 : i32 to vector<1x8xi32>
    %58 = arith.addi %57, %56 : vector<1x8xi32>
    %59 = vector.broadcast %54 : vector<8x1xi32> to vector<8x8xi32>
    %60 = vector.broadcast %58 : vector<1x8xi32> to vector<8x8xi32>
    %61 = arith.cmpi ne, %59, %60 : vector<8x8xi32>
    %c4_i32 = arith.constant 4 : i32
    %62 = vector.broadcast %c4_i32 : i32 to vector<1x8xi32>
    %63 = arith.cmpi slt, %58, %62 : vector<1x8xi32>
    %64 = vector.broadcast %63 : vector<1x8xi1> to vector<8x8xi1>
    %65 = arith.andi %61, %64 : vector<8x8xi1>
    %cst_22 = arith.constant -1.000000e+30 : f32
    %66 = vector.broadcast %cst_22 : f32 to vector<8x8xf32>
    %67 = arith.select %65, %47, %66 : vector<8x8xi1>, vector<8x8xf32>
    %cst_23 = arith.constant -1.000000e+30 : f32
    %68 = vector.broadcast %cst_23 : f32 to vector<8x8xf32>
    %69 = arith.select %65, %50, %68 : vector<8x8xi1>, vector<8x8xf32>
    %cst_24 = arith.constant -1.000000e+30 : f32
    %70 = vector.shape_cast %63 : vector<1x8xi1> to vector<1x8xi1>
    %71 = vector.broadcast %70 : vector<1x8xi1> to vector<8x8xi1>
    %72 = vector.broadcast %cst_24 : f32 to vector<8x8xf32>
    %73 = arith.select %71, %48, %72 : vector<8x8xi1>, vector<8x8xf32>
    %cst_25 = arith.constant -1.000000e+30 : f32
    %74 = vector.shape_cast %63 : vector<1x8xi1> to vector<1x8xi1>
    %75 = vector.broadcast %74 : vector<1x8xi1> to vector<8x8xi1>
    %76 = vector.broadcast %cst_25 : f32 to vector<8x8xf32>
    %77 = arith.select %75, %49, %76 : vector<8x8xi1>, vector<8x8xf32>
    %cst_26 = arith.constant dense<0xFF800000> : vector<8xf32>
    %78 = vector.multi_reduction <maximumf>, %67, %cst_26 [1] : vector<8x8xf32> to vector<8xf32>
    %79 = vector.shape_cast %78 : vector<8xf32> to vector<8x1xf32>
    %cst_27 = arith.constant dense<0xFF800000> : vector<8xf32>
    %80 = vector.multi_reduction <maximumf>, %73, %cst_27 [1] : vector<8x8xf32> to vector<8xf32>
    %81 = vector.shape_cast %80 : vector<8xf32> to vector<8x1xf32>
    %82 = arith.maximumf %79, %81 : vector<8x1xf32>
    %c0_28 = arith.constant 0 : index
    %c0_29 = arith.constant 0 : index
    %83 = vector.load %arg8[%c0_28, %c0_29] : memref<8x1xf32, #tpu.memory_space<vmem>>, vector<8x1xf32>
    %84 = arith.maximumf %83, %82 : vector<8x1xf32>
    %c0_30 = arith.constant 0 : index
    %c0_31 = arith.constant 0 : index
    %85 = vector.load %arg8[%c0_30, %c0_31] : memref<8x1xf32, #tpu.memory_space<vmem>>, vector<8x1xf32>
    %86 = arith.subf %85, %84 : vector<8x1xf32>
    %87 = math.exp %86 : vector<8x1xf32>
    %c0_32 = arith.constant 0 : index
    %c0_33 = arith.constant 0 : index
    %88 = vector.load %arg9[%c0_32, %c0_33] : memref<8x1xf32, #tpu.memory_space<vmem>>, vector<8x1xf32>
    %89 = arith.mulf %87, %88 : vector<8x1xf32>
    %90 = vector.broadcast %84 : vector<8x1xf32> to vector<8x8xf32>
    %91 = arith.subf %67, %90 : vector<8x8xf32>
    %92 = math.exp %91 : vector<8x8xf32>
    %cst_34 = arith.constant dense<0.000000e+00> : vector<8xf32>
    %93 = vector.multi_reduction <add>, %92, %cst_34 [1] : vector<8x8xf32> to vector<8xf32>
    %94 = vector.shape_cast %93 : vector<8xf32> to vector<8x1xf32>
    %95 = arith.addf %89, %94 : vector<8x1xf32>
    %96 = vector.broadcast %84 : vector<8x1xf32> to vector<8x8xf32>
    %97 = arith.subf %73, %96 : vector<8x8xf32>
    %98 = math.exp %97 : vector<8x8xf32>
    %cst_35 = arith.constant dense<0.000000e+00> : vector<8xf32>
    %99 = vector.multi_reduction <add>, %98, %cst_35 [1] : vector<8x8xf32> to vector<8xf32>
    %100 = vector.shape_cast %99 : vector<8xf32> to vector<8x1xf32>
    %101 = arith.addf %95, %100 : vector<8x1xf32>
    %c0_36 = arith.constant 0 : index
    %c0_37 = arith.constant 0 : index
    %102 = vector.load %arg9[%c0_36, %c0_37] : memref<8x1xf32, #tpu.memory_space<vmem>>, vector<8x1xf32>
    tpu.vector_store %arg9[%c0_36, %c0_37], %101 {strides = array<i32>} : memref<8x1xf32, #tpu.memory_space<vmem>>, vector<8x1xf32>,
    %c0_38 = arith.constant 0 : index
    %c0_39 = arith.constant 0 : index
    %103 = vector.load %arg8[%c0_38, %c0_39] : memref<8x1xf32, #tpu.memory_space<vmem>>, vector<8x1xf32>
    tpu.vector_store %arg8[%c0_38, %c0_39], %84 {strides = array<i32>} : memref<8x1xf32, #tpu.memory_space<vmem>>, vector<8x1xf32>,
    %cst_40 = arith.constant dense<0xFF800000> : vector<8xf32>
    %104 = vector.multi_reduction <maximumf>, %77, %cst_40 [1] : vector<8x8xf32> to vector<8xf32>
    %105 = vector.shape_cast %104 : vector<8xf32> to vector<8x1xf32>
    %cst_41 = arith.constant dense<0xFF800000> : vector<8xf32>
    %106 = vector.multi_reduction <maximumf>, %69, %cst_41 [1] : vector<8x8xf32> to vector<8xf32>
    %107 = vector.shape_cast %106 : vector<8xf32> to vector<8x1xf32>
    %108 = arith.maximumf %105, %107 : vector<8x1xf32>
    %c0_42 = arith.constant 0 : index
    %c0_43 = arith.constant 0 : index
    %109 = vector.load %arg10[%c0_42, %c0_43] : memref<8x1xf32, #tpu.memory_space<vmem>>, vector<8x1xf32>
    %110 = arith.maximumf %109, %108 : vector<8x1xf32>
    %c0_44 = arith.constant 0 : index
    %c0_45 = arith.constant 0 : index
    %111 = vector.load %arg10[%c0_44, %c0_45] : memref<8x1xf32, #tpu.memory_space<vmem>>, vector<8x1xf32>
    %112 = arith.subf %111, %110 : vector<8x1xf32>
    %113 = math.exp %112 : vector<8x1xf32>
    %c0_46 = arith.constant 0 : index
    %c0_47 = arith.constant 0 : index
    %114 = vector.load %arg11[%c0_46, %c0_47] : memref<8x1xf32, #tpu.memory_space<vmem>>, vector<8x1xf32>
    %115 = arith.mulf %113, %114 : vector<8x1xf32>
    %116 = vector.broadcast %110 : vector<8x1xf32> to vector<8x8xf32>
    %117 = arith.subf %77, %116 : vector<8x8xf32>
    %118 = math.exp %117 : vector<8x8xf32>
    %cst_48 = arith.constant dense<0.000000e+00> : vector<8xf32>
    %119 = vector.multi_reduction <add>, %118, %cst_48 [1] : vector<8x8xf32> to vector<8xf32>
    %120 = vector.shape_cast %119 : vector<8xf32> to vector<8x1xf32>
    %121 = arith.addf %115, %120 : vector<8x1xf32>
    %122 = vector.broadcast %110 : vector<8x1xf32> to vector<8x8xf32>
    %123 = arith.subf %69, %122 : vector<8x8xf32>
    %124 = math.exp %123 : vector<8x8xf32>
    %cst_49 = arith.constant dense<0.000000e+00> : vector<8xf32>
    %125 = vector.multi_reduction <add>, %124, %cst_49 [1] : vector<8x8xf32> to vector<8xf32>
    %126 = vector.shape_cast %125 : vector<8xf32> to vector<8x1xf32>
    %127 = arith.addf %121, %126 : vector<8x1xf32>
    %c0_50 = arith.constant 0 : index
    %c0_51 = arith.constant 0 : index
    %128 = vector.load %arg11[%c0_50, %c0_51] : memref<8x1xf32, #tpu.memory_space<vmem>>, vector<8x1xf32>
    tpu.vector_store %arg11[%c0_50, %c0_51], %127 {strides = array<i32>} : memref<8x1xf32, #tpu.memory_space<vmem>>, vector<8x1xf32>,
    %c0_52 = arith.constant 0 : index
    %c0_53 = arith.constant 0 : index
    %129 = vector.load %arg10[%c0_52, %c0_53] : memref<8x1xf32, #tpu.memory_space<vmem>>, vector<8x1xf32>
    tpu.vector_store %arg10[%c0_52, %c0_53], %110 {strides = array<i32>} : memref<8x1xf32, #tpu.memory_space<vmem>>, vector<8x1xf32>,
    %c0_i32_54 = arith.constant 0 : i32
    %130 = arith.cmpi eq, %arg1, %c0_i32_54 : i32
    %131 = arith.extui %130 : i1 to i32
    %c0_i32_55 = arith.constant 0 : i32
    %132 = arith.cmpi ne, %131, %c0_i32_55 : i32
    scf.if %132 {
      %c0_56 = arith.constant 0 : index
      %c0_57 = arith.constant 0 : index
      %133 = vector.load %arg2[%c0_56, %c0_57] : memref<8x128xf32, #tpu.memory_space<vmem>>, vector<8x128xf32>
      %134 = arith.mulf %133, %133 : vector<8x128xf32>
      %cst_58 = arith.constant dense<0.000000e+00> : vector<8xf32>
      %135 = vector.multi_reduction <add>, %134, %cst_58 [1] : vector<8x128xf32> to vector<8xf32>
      %136 = vector.shape_cast %135 : vector<8xf32> to vector<8x1xf32>
      %cst_59 = arith.constant 1.000000e-16 : f32
      %137 = vector.broadcast %cst_59 : f32 to vector<8x1xf32>
      %138 = arith.maximumf %136, %137 : vector<8x1xf32>
      %139 = math.rsqrt %138 : vector<8x1xf32>
      %140 = vector.broadcast %139 : vector<8x1xf32> to vector<8x128xf32>
      %141 = arith.mulf %133, %140 : vector<8x128xf32>
      %cst_60 = arith.constant 2.000000e+00 : f32
      %142 = vector.broadcast %cst_60 : f32 to vector<8x128xf32>
      %143 = arith.mulf %141, %142 : vector<8x128xf32>
      %144 = arith.truncf %143 : vector<8x128xf32> to vector<8x128xbf16>
      %145 = arith.extf %144 : vector<8x128xbf16> to vector<8x128xf32>
      %c0_61 = arith.constant 0 : index
      %c0_62 = arith.constant 0 : index
      %146 = vector.load %arg3[%c0_61, %c0_62] : memref<8x128xf32, #tpu.memory_space<vmem>>, vector<8x128xf32>
      %147 = arith.mulf %146, %146 : vector<8x128xf32>
      %cst_63 = arith.constant dense<0.000000e+00> : vector<8xf32>
      %148 = vector.multi_reduction <add>, %147, %cst_63 [1] : vector<8x128xf32> to vector<8xf32>
      %149 = vector.shape_cast %148 : vector<8xf32> to vector<8x1xf32>
      %cst_64 = arith.constant 1.000000e-16 : f32
      %150 = vector.broadcast %cst_64 : f32 to vector<8x1xf32>
      %151 = arith.maximumf %149, %150 : vector<8x1xf32>
      %152 = math.rsqrt %151 : vector<8x1xf32>
      %153 = vector.broadcast %152 : vector<8x1xf32> to vector<8x128xf32>
      %154 = arith.mulf %146, %153 : vector<8x128xf32>
      %cst_65 = arith.constant 2.000000e+00 : f32
      %155 = vector.broadcast %cst_65 : f32 to vector<8x128xf32>
      %156 = arith.mulf %154, %155 : vector<8x128xf32>
      %157 = arith.truncf %156 : vector<8x128xf32> to vector<8x128xbf16>
      %158 = arith.extf %157 : vector<8x128xbf16> to vector<8x128xf32>
      %159 = arith.extf %12 : vector<8x128xbf16> to vector<8x128xf32>
      %160 = arith.mulf %159, %158 : vector<8x128xf32>
      %cst_66 = arith.constant dense<0.000000e+00> : vector<8xf32>
      %161 = vector.multi_reduction <add>, %160, %cst_66 [1] : vector<8x128xf32> to vector<8xf32>
      %162 = vector.shape_cast %161 : vector<8xf32> to vector<8x1xf32>
      %163 = arith.extf %22 : vector<8x128xbf16> to vector<8x128xf32>
      %164 = arith.mulf %163, %145 : vector<8x128xf32>
      %cst_67 = arith.constant dense<0.000000e+00> : vector<8xf32>
      %165 = vector.multi_reduction <add>, %164, %cst_67 [1] : vector<8x128xf32> to vector<8xf32>
      %166 = vector.shape_cast %165 : vector<8xf32> to vector<8x1xf32>
      %c0_68 = arith.constant 0 : index
      %c0_69 = arith.constant 0 : index
      %167 = vector.load %arg9[%c0_68, %c0_69] : memref<8x1xf32, #tpu.memory_space<vmem>>, vector<8x1xf32>
      %168 = math.log %167 : vector<8x1xf32>
      %c0_70 = arith.constant 0 : index
      %c0_71 = arith.constant 0 : index
      %169 = vector.load %arg8[%c0_70, %c0_71] : memref<8x1xf32, #tpu.memory_space<vmem>>, vector<8x1xf32>
      %170 = arith.addf %168, %169 : vector<8x1xf32>
      %171 = arith.subf %170, %162 : vector<8x1xf32>
      %c0_72 = arith.constant 0 : index
      %c0_73 = arith.constant 0 : index
      %172 = vector.load %arg6[%c0_72, %c0_73] : memref<8x1xf32, #tpu.memory_space<vmem>>, vector<8x1xf32>
      tpu.vector_store %arg6[%c0_72, %c0_73], %171 {strides = array<i32>} : memref<8x1xf32, #tpu.memory_space<vmem>>, vector<8x1xf32>,
      %c0_74 = arith.constant 0 : index
      %c0_75 = arith.constant 0 : index
      %173 = vector.load %arg11[%c0_74, %c0_75] : memref<8x1xf32, #tpu.memory_space<vmem>>, vector<8x1xf32>
      %174 = math.log %173 : vector<8x1xf32>
      %c0_76 = arith.constant 0 : index
      %c0_77 = arith.constant 0 : index
      %175 = vector.load %arg10[%c0_76, %c0_77] : memref<8x1xf32, #tpu.memory_space<vmem>>, vector<8x1xf32>
      %176 = arith.addf %174, %175 : vector<8x1xf32>
      %177 = arith.subf %176, %166 : vector<8x1xf32>
      %c0_78 = arith.constant 0 : index
      %c0_79 = arith.constant 0 : index
      %178 = vector.load %arg7[%c0_78, %c0_79] : memref<8x1xf32, #tpu.memory_space<vmem>>, vector<8x1xf32>
      tpu.vector_store %arg7[%c0_78, %c0_79], %177 {strides = array<i32>} : memref<8x1xf32, #tpu.memory_space<vmem>>, vector<8x1xf32>,
    } else {
    }
    return
  }
  func.func @transform_0(%arg0: i32, %arg1: i32) -> (i32, i32) {
    %c0_i32 = arith.constant 0 : i32
    %c0_i32_0 = arith.constant 0 : i32
    return %arg0, %c0_i32 : i32, i32
  }
  func.func @transform_1(%arg0: i32, %arg1: i32) -> (i32, i32) {
    %c0_i32 = arith.constant 0 : i32
    %c0_i32_0 = arith.constant 0 : i32
    return %arg0, %c0_i32 : i32, i32
  }
  func.func @transform_2(%arg0: i32, %arg1: i32) -> (i32, i32) {
    %c0_i32 = arith.constant 0 : i32
    %c0_i32_0 = arith.constant 0 : i32
    return %arg1, %c0_i32 : i32, i32
  }
  func.func @transform_3(%arg0: i32, %arg1: i32) -> (i32, i32) {
    %c0_i32 = arith.constant 0 : i32
    %c0_i32_0 = arith.constant 0 : i32
    return %arg1, %c0_i32 : i32, i32
  }
  func.func @transform_4(%arg0: i32, %arg1: i32) -> (i32, i32) {
    %c0_i32 = arith.constant 0 : i32
    %c0_i32_0 = arith.constant 0 : i32
    return %arg0, %c0_i32 : i32, i32
  }
  func.func @transform_5(%arg0: i32, %arg1: i32) -> (i32, i32) {
    %c0_i32 = arith.constant 0 : i32
    %c0_i32_0 = arith.constant 0 : i32
    return %arg0, %c0_i32 : i32, i32
  }
}

</mosaic_0001>

<bundles_post_ra>
// kernel: tpu_custom_call.1
= control target key start
LH: loop header
LB: loop body
LE: loop exit
PB: predicated region body
PF: predicated region fallthrough
CT: control target
= control target key end

     0   :  { %11 = vsyncpa [#allocation7], 0  ;;  %s702_s0 = inlined_call_operand.hbm [shape: f32[8,128], index: 0, kind: input, shape index: {}]   ;;  %s703_s1 = inlined_call_operand.hbm [shape: f32[8,128], index: 1, kind: input, shape index: {}]   ;;  %s704_s2 = inlined_call_operand.hbm [shape: f32[8,128], index: 2, kind: input, shape index: {}]   ;;  %s705_s3 = inlined_call_operand.vmem [shape: f32[8,128], index: 3, kind: input, shape index: {}]   ;;  %s706_s4 = inlined_call_operand.vmem [shape: f32[8,1], index: 4, kind: output, shape index: {0}]   ;;  %s707_s5 = inlined_call_operand.vmem [shape: f32[8,1], index: 5, kind: output, shape index: {1}]  }
   0x1   :  { %12 = vsyncpa [#allocation9], 0  ;;  %s543_s18 = smov [#allocation8]   ;;  %s544_s20 = smov [#allocation6]  }
   0x2   :  { %s29_s19 = sshll.u32 %s543_s18, 4  ;;  %s19_s21 = sshll.u32 %s544_s20, 4  ;;  %s30_s19 = int_to_ptr.vmem [resolvable:$true] %s29_s19  ;;  %s20_s21 = int_to_ptr.vmem [resolvable:$true] %s19_s21 }
   0x3   :  { %s473_s24 = scalar_lea.hbm %s703_s1, 128 }
   0x4   :  { %p474_p0 = scmp.ne.s32.totalorder %s703_s1, %s473_s24  ;;  %p477_p1 = scmp.lt.u32.totalorder %s473_s24, %s703_s1 }
   0x6   :  { %p479_p2 = pnand %p477_p1, %p474_p0 }
   0x8   :  { %482 = shalt.err (!%p479_p2)
}
   0x9   :  { %s483_s29 = scalar_lea.vmem %s30_s19, 128  ;;  %p488_p4 = scmp.lt.s32.totalorder %s30_s19, %s30_s19 }
   0xa   :  { %p484_p3 = scmp.ne.s32.totalorder %s30_s19, %s483_s29  ;;  %p489_p5 = scmp.lt.s32.totalorder %s483_s29, %s483_s29 }
   0xc   :  { %p490_p6 = por %p489_p5, %p488_p4 }
   0xe   :  { %p491_p7 = pnand %p490_p6, %p484_p3 }
  0x10   :  { %494 = shalt.err (!%p491_p7)
}
  0x11   :  { %32 = dma.hbm_to_vmem [thread:$0]  %s703_s1, 128, %s30_s19, [#allocation9]  }
  0x12   :  { %s495_s9 = scalar_lea.hbm %s702_s0, 128 }
  0x13   :  { %p496_p8 = scmp.ne.s32.totalorder %s702_s0, %s495_s9  ;;  %p499_p9 = scmp.lt.u32.totalorder %s495_s9, %s702_s0 }
  0x15   :  { %p501_p10 = pnand %p499_p9, %p496_p8 }
  0x17   :  { %504 = shalt.err (!%p501_p10)
}
  0x18   :  { %s505_s14 = scalar_lea.vmem %s20_s21, 128  ;;  %p510_p12 = scmp.lt.s32.totalorder %s20_s21, %s20_s21 }
  0x19   :  { %p506_p11 = scmp.ne.s32.totalorder %s20_s21, %s505_s14  ;;  %p511_p13 = scmp.lt.s32.totalorder %s505_s14, %s505_s14 }
  0x1b   :  { %p512_p0 = por %p511_p13, %p510_p12 }
  0x1d   :  { %p513_p1 = pnand %p512_p0, %p506_p11 }
  0x1f   :  { %516 = shalt.err (!%p513_p1)
}
  0x20   :  { %22 = dma.hbm_to_vmem [thread:$0]  %s702_s0, 128, %s20_s21, [#allocation7]  }
  0x21   :  { %s545_s16 = smov [#allocation10]   ;;  %s517_s20 = scalar_lea.hbm %s704_s2, 128 }
  0x22   :  { %s39_s17 = sshll.u32 %s545_s16, 4  ;;  %p518_p2 = scmp.ne.s32.totalorder %s704_s2, %s517_s20  ;;  %s40_s17 = int_to_ptr.vmem [resolvable:$true] %s39_s17 }
  0x23   :  { %p521_p3 = scmp.lt.u32.totalorder %s517_s20, %s704_s2 }
  0x25   :  { %p523_p4 = pnand %p521_p3, %p518_p2 }
  0x27   :  { %526 = shalt.err (!%p523_p4)
}
  0x28   :  { %s527_s26 = scalar_lea.vmem %s40_s17, 128  ;;  %p532_p6 = scmp.lt.s32.totalorder %s40_s17, %s40_s17 }
  0x29   :  { %p528_p5 = scmp.ne.s32.totalorder %s40_s17, %s527_s26  ;;  %p533_p7 = scmp.lt.s32.totalorder %s527_s26, %s527_s26 }
  0x2b   :  { %p534_p8 = por %p533_p7, %p532_p6 }
  0x2d   :  { %p535_p9 = pnand %p534_p8, %p528_p5 }
  0x2f   :  { %538 = shalt.err (!%p535_p9)
}
  0x30   :  { %42 = dma.hbm_to_vmem [thread:$0]  %s704_s2, 128, %s40_s17, [#allocation9]  }
  0x31   :  { %539 = dma.done.wait [#allocation7], 128  }
  0x32   :  { %540 = vsyncadd [#allocation7], 4294967168 }
  0x33   :  { %541 = dma.done.wait [#allocation9], 256  }
  0x34   :  { %542 = vsyncadd [#allocation9], 4294967040  ;;  %v80_v0 = vld [vmem:[#allocation10] sm:$0xff]  ;;  %v619_v2 = vld [vmem:[#allocation6] sm:$0xff]  ;;  %v546_v8 = vmov 0.0   ;;  %vm547_vm0 = vmmov 0   ;;  %v259_v31 = vlaneseq }
  0x35   :  { %v89_v1 = vld [vmem:[%s705_s3] sm:$0xff]  ;;  %v81_v3 = vmul.f32 %v80_v0, %v80_v0  ;;  %v623_v4 = vmul.f32 %v619_v2, %v619_v2  ;;  %v625_v5 = vld [vmem:[#allocation8] sm:$0xff]  ;;  %412 = vmatprep.subr.bf16.mxu0 %v546_v8  ;;  %418 = vmatprep.subr.bf16.mxu1 %v546_v8  ;;  %vm277_vm4 = vcmask 64512   ;;  %vm59_vm5 = vcmask 7168  }
  0x36   :  { %v90_v6 = vmul.f32 %v89_v1, %v89_v1  ;;  %v630_v7 = vmul.f32 %v625_v5, %v625_v5  ;;  %414 = vmatprep.mubr.msk.bf16.mxu0 %vm547_vm0, %v546_v8  ;;  %420 = vmatprep.mubr.msk.bf16.mxu1 %vm547_vm0, %v546_v8  ;;  %v260_v32 = vshrl.u32 %v259_v31, 7  ;;  %v265_v33 = vand.u32 127, %v259_v31  ;;  %61 = vst.msk [vmem:[#allocation3] sm:$0xff] %vm59_vm5, %v546_v8 }
  0x37   :  { %82 = vadd.xlane.f32.xlu0 %v81_v3  ;;  %66 = vadd.xlane.f32.xlu1 %v623_v4  ;;  %v548_v59 = vmov -inf   ;;  %63 = vst.msk [vmem:[#allocation5] sm:$0xff] %vm59_vm5, %v546_v8  ;;  %v549_v60 = vmov 0  }
  0x38   :  { %vm268_vm1 = vcmp.ne.s32.totalorder %v260_v32, %v265_v33  ;;  %vm269_vm2 = vcmp.lt.s32.totalorder %v265_v33, 4  ;;  %60 = vst.msk [vmem:[#allocation2] sm:$0xff] %vm59_vm5, %v548_v59  ;;  %62 = vst.msk [vmem:[#allocation4] sm:$0xff] %vm59_vm5, %v548_v59  ;;  %443 = vset.pattern.permute.xlu0 %v549_v60  ;;  %444 = vset.pattern.permute.xlu1 %v549_v60 }
  0x39   :  { %vm656_vm3 = vmand %vm268_vm1, %vm269_vm2 }
  0x3b   :  { %91 = vadd.xlane.f32.xlu0 %v90_v6  ;;  %74 = vadd.xlane.f32.xlu1 %v630_v7 }
  0x3f   :  { %v676_v63 = vld [vmem:[#allocation2] sm:$0xff] }
  0xc4   :  { %v83_v9 = vpop.xlane.xlu0 %82  ;;  %v67_v10 = vpop.xlane.xlu1 %66 }
  0xc5   :  { %v84_v11 = vmax.f32 %v83_v9, 1e-16  ;;  %v68_v12 = vmax.f32 %v67_v10, 1e-16  ;;  %v321_v10 = vld [vmem:[#allocation4] sm:$0xff] }
  0xc7   :  { %445 = vrsqrt.f32 %v84_v11 }
  0xc8   :  { %v92_v13 = vpop.xlane.xlu0 %91  ;;  %447 = vrsqrt.f32 %v68_v12  ;;  %v75_v15 = vpop.xlane.xlu1 %74 }
  0xc9   :  { %v93_v14 = vmax.f32 %v92_v13, 1e-16  ;;  %v76_v16 = vmax.f32 %v75_v15, 1e-16 }
  0xcb   :  { %449 = vrsqrt.f32 %v93_v14 }
  0xcc   :  { %451 = vrsqrt.f32 %v76_v16 }
  0xd1   :  { %v446_v17 = vpop.eup %445 }
  0xd2   :  { %v86_v18 = vmul.f32 %v446_v17, %v80_v0  ;;  %v448_v19 = vpop.eup %447 }
  0xd3   :  { %v70_v24 = vmul.f32 %v448_v19, %v619_v2 }
  0xd4   :  { %v87_v20 = vmul.f32 2.0, %v86_v18 }
  0xd5   :  { %v450_v21 = vpop.eup %449  ;;  %v641_v27 = vpack.c.bf16 %v70_v24, %v70_v24 }
  0xd6   :  { %v88_v22 = vpack.c.bf16 %v87_v20, %v87_v20  ;;  %v95_v23 = vmul.f32 %v450_v21, %v89_v1  ;;  %v452_v28 = vpop.eup %451 }
  0xd7   :  { %v78_v29 = vmul.f32 %v452_v28, %v625_v5 }
  0xd8   :  { %413 = vmatpush3.bf16.xpose.msra.mxu0 %v88_v22  ;;  %v96_v25 = vmul.f32 2.0, %v95_v23 }
  0xd9   :  { %424 = vmatprep.subr.bf16.mxu0 %v546_v8  ;;  %v649_v30 = vpack.c.bf16 %v78_v29, %v78_v29 }
  0xda   :  { %v97_v26 = vpack.c.bf16 %v96_v25, %v96_v25 }
  0xdc   :  { %419 = vmatpush3.bf16.xpose.msra.mxu1 %v97_v26 }
  0xdd   :  { %430 = vmatprep.subr.bf16.mxu1 %v546_v8 }
  0xdf   :  { %415 = vmatmul.mubr.bf16.vlgmr.msra.gmra.mrb[0].mxu0 %v641_v27 }
  0xe0   :  { %425 = vmatpush3.bf16.xpose.msra.mxu0 %v88_v22  ;;  %426 = vmatprep.mubr.msk.bf16.mxu0 %vm547_vm0, %v546_v8 }
  0xe3   :  { %421 = vmatmul.mubr.bf16.vlgmr.msra.gmra.mrb[0].mxu1 %v641_v27 }
  0xe4   :  { %431 = vmatpush3.bf16.xpose.msra.mxu1 %v97_v26  ;;  %432 = vmatprep.mubr.msk.bf16.mxu1 %vm547_vm0, %v546_v8 }
  0xe7   :  { %427 = vmatmul.mubr.bf16.vlgmr.msra.gmra.mrb[4].mxu0 %v649_v30 }
  0xeb   :  { %433 = vmatmul.mubr.bf16.vlgmr.msra.gmra.mrb[4].mxu1 %v649_v30 }
 0x1b2   :  { %v132_v35 = vpop.f32.mrb[0].mxu0 }
 0x1b3   :  { %v273_v36 = vsel %vm656_vm3, %v132_v35, -1e+30  ;;  %v416_v37 = vpop.f32.mrb[1].mxu0 }
 0x1b4   :  { %v135_v38 = vpop.f32.mrb[2].mxu0  ;;  %v278_v39 = vsel %vm277_vm4, %v273_v36, -inf }
 0x1b5   :  { %v417_v40 = vpop.f32.mrb[3].mxu0  ;;  %279 = vmax.xlane.f32.xlu0 %v278_v39 }
 0x1b6   :  { %v172_v41 = vpop.f32.mrb[0].mxu1  ;;  %v372_v40 = vunpack.c.l.bf16 %v641_v27 }
 0x1b7   :  { %v275_v42 = vsel %vm269_vm2, %v172_v41, -1e+30  ;;  %v422_v43 = vpop.f32.mrb[1].mxu1 }
 0x1b8   :  { %v175_v44 = vpop.f32.mrb[2].mxu1  ;;  %v281_v45 = vsel %vm277_vm4, %v275_v42, -inf }
 0x1b9   :  { %282 = vmax.xlane.f32.xlu1 %v281_v45  ;;  %v423_v46 = vpop.f32.mrb[3].mxu1 }
 0x1ba   :  { %v212_v47 = vpop.f32.mrb[4].mxu0 }
 0x1bb   :  { %v276_v48 = vsel %vm269_vm2, %v212_v47, -1e+30  ;;  %v428_v49 = vpop.f32.mrb[5].mxu0  ;;  %v376_v47 = vunpack.c.l.bf16 %v649_v30 }
 0x1bc   :  { %v215_v50 = vpop.f32.mrb[6].mxu0  ;;  %v314_v51 = vsel %vm277_vm4, %v276_v48, -inf }
 0x1bd   :  { %v429_v52 = vpop.f32.mrb[7].mxu0  ;;  %315 = vmax.xlane.f32.xlu0 %v314_v51  ;;  %v290_v51 = vld [vmem:[#allocation3] sm:$0xff] }
 0x1be   :  { %v252_v53 = vpop.f32.mrb[4].mxu1 }
 0x1bf   :  { %v274_v54 = vsel %vm656_vm3, %v252_v53, -1e+30  ;;  %v434_v55 = vpop.f32.mrb[5].mxu1 }
 0x1c0   :  { %v255_v56 = vpop.f32.mrb[6].mxu1  ;;  %v317_v57 = vsel %vm277_vm4, %v274_v54, -inf }
 0x1c1   :  { %318 = vmax.xlane.f32.xlu1 %v317_v57  ;;  %v435_v58 = vpop.f32.mrb[7].mxu1 }
 0x242   :  { %v280_v61 = vpop.xlane.xlu0 %279 }
 0x246   :  { %v283_v62 = vpop.xlane.xlu1 %282 }
 0x247   :  { %v284_v0 = vmax.f32 %v280_v61, %v283_v62 }
 0x249   :  { %v286_v1 = vmax.f32 %v676_v63, %v284_v0 }
 0x24a   :  { %v316_v6 = vpop.xlane.xlu0 %315 }
 0x24b   :  { %v287_v3 = vsub.f32 %v676_v63, %v286_v1  ;;  %313 = vst.msk [vmem:[#allocation2] sm:$0xff] %vm59_vm5, %v286_v1  ;;  %294 = vperm.xlu0 %443, %v286_v1  }
 0x24d   :  { %v288_v49 = vmul.f32 1.442695, %v287_v3 }
 0x24e   :  { %v319_v9 = vpop.xlane.xlu1 %318 }
 0x24f   :  { %v320_v11 = vmax.f32 %v316_v6, %v319_v9 }
 0x251   :  { %v322_v8 = vmax.f32 %v321_v10, %v320_v11 }
 0x252   :  { %v383_v1 = vld [vmem:[#allocation2] sm:$0xff] }
 0x253   :  { %v323_v12 = vsub.f32 %v321_v10, %v322_v8  ;;  %348 = vst.msk [vmem:[#allocation4] sm:$0xff] %vm59_vm5, %v322_v8  ;;  %330 = vperm.xlu1 %444, %v322_v8  }
 0x25a   :  { %v390_v8 = vld [vmem:[#allocation4] sm:$0xff] }
 0x26a   :  { %364 = vadd.xlane.f32.xlu0 %v630_v7 }
 0x277   :  { %354 = vadd.xlane.f32.xlu1 %v623_v4 }
 0x2ca   :  { %v295_v13 = vpop.permute.xlu0 %294 }
 0x2cb   :  { %v297_v14 = vsub.f32 %v273_v36, %v295_v13  ;;  %v304_v15 = vsub.f32 %v275_v42, %v295_v13 }
 0x2cd   :  { %v298_v16 = vmul.f32 1.442695, %v297_v14  ;;  %v305_v17 = vmul.f32 1.442695, %v304_v15 }
 0x2cf   :  { %453 = vpow2.f32 %v298_v16 }
 0x2d0   :  { %455 = vpow2.f32 %v305_v17 }
 0x2d2   :  { %v331_v18 = vpop.permute.xlu1 %330 }
 0x2d3   :  { %v333_v19 = vsub.f32 %v276_v48, %v331_v18  ;;  %v340_v20 = vsub.f32 %v274_v54, %v331_v18 }
 0x2d5   :  { %v334_v21 = vmul.f32 1.442695, %v333_v19  ;;  %v341_v22 = vmul.f32 1.442695, %v340_v20 }
 0x2d7   :  { %457 = vpow2.f32 %v334_v21 }
 0x2d8   :  { %459 = vpow2.f32 %v341_v22 }
 0x2d9   :  { %v454_v23 = vpop.eup %453 }
 0x2da   :  { %v300_v24 = vsel %vm277_vm4, %v454_v23, 0.0  ;;  %v456_v7 = vpop.eup %455 }
 0x2db   :  { %301 = vadd.xlane.f32.xlu1 %v300_v24  ;;  %v307_v4 = vsel %vm277_vm4, %v456_v7, 0.0 }
 0x2df   :  { %308 = vadd.xlane.f32.xlu1 %v307_v4 }
 0x2e1   :  { %v458_v25 = vpop.eup %457 }
 0x2e2   :  { %v336_v26 = vsel %vm277_vm4, %v458_v25, 0.0  ;;  %v460_v28 = vpop.eup %459 }
 0x2e3   :  { %337 = vadd.xlane.f32.xlu1 %v336_v26  ;;  %v343_v29 = vsel %vm277_vm4, %v460_v28, 0.0 }
 0x2e7   :  { %344 = vadd.xlane.f32.xlu1 %v343_v29 }
 0x2f7   :  { %v365_v31 = vpop.xlane.xlu0 %364 }
 0x2f8   :  { %v366_v32 = vmax.f32 %v365_v31, 1e-16 }
 0x2fa   :  { %461 = vrsqrt.f32 %v366_v32 }
 0x304   :  { %v462_v33 = vpop.eup %461  ;;  %v355_v34 = vpop.xlane.xlu1 %354 }
 0x305   :  { %v356_v35 = vmax.f32 %v355_v34, 1e-16  ;;  %v368_v36 = vmul.f32 %v462_v33, %v625_v5  ;;  %v324_v5 = vmul.f32 1.442695, %v323_v12 }
 0x307   :  { %463 = vrsqrt.f32 %v356_v35  ;;  %v369_v37 = vmul.f32 2.0, %v368_v36 }
 0x308   :  { %465 = vpow2.f32 %v288_v49 }
 0x309   :  { %v370_v38 = vpack.c.bf16 %v369_v37, %v369_v37  ;;  %467 = vpow2.f32 %v324_v5 }
 0x30b   :  { %v371_v39 = vunpack.c.l.bf16 %v370_v38 }
 0x30d   :  { %v373_v41 = vmul.f32 %v372_v40, %v371_v39 }
 0x30f   :  { %374 = vadd.xlane.f32.xlu1 %v373_v41 }
 0x311   :  { %v464_v42 = vpop.eup %463 }
 0x312   :  { %v358_v43 = vmul.f32 %v464_v42, %v619_v2  ;;  %v466_v50 = vpop.eup %465  ;;  %v326_v2 = vld [vmem:[#allocation5] sm:$0xff] }
 0x313   :  { %v291_v27 = vmul.f32 %v466_v50, %v290_v51  ;;  %v468_v56 = vpop.eup %467 }
 0x314   :  { %v359_v44 = vmul.f32 2.0, %v358_v43  ;;  %v327_v58 = vmul.f32 %v468_v56, %v326_v2 }
 0x316   :  { %v360_v45 = vpack.c.bf16 %v359_v44, %v359_v44 }
 0x318   :  { %v361_v46 = vunpack.c.l.bf16 %v360_v45 }
 0x31a   :  { %v377_v48 = vmul.f32 %v376_v47, %v361_v46 }
 0x31c   :  { %378 = vadd.xlane.f32.xlu1 %v377_v48 }
 0x368   :  { %v302_v52 = vpop.xlane.xlu1 %301 }
 0x369   :  { %v303_v53 = vadd.f32 %v302_v52, %v291_v27 }
 0x36c   :  { %v309_v54 = vpop.xlane.xlu1 %308 }
 0x36d   :  { %v310_v55 = vadd.f32 %v309_v54, %v303_v53 }
 0x36f   :  { %312 = vst.msk [vmem:[#allocation3] sm:$0xff] %vm59_vm5, %v310_v55 }
 0x370   :  { %v338_v57 = vpop.xlane.xlu1 %337 }
 0x371   :  { %v339_v30 = vadd.f32 %v338_v57, %v327_v58 }
 0x374   :  { %v345_v59 = vpop.xlane.xlu1 %344 }
 0x375   :  { %v346_v60 = vadd.f32 %v345_v59, %v339_v30 }
 0x376   :  { %v380_v61 = vld [vmem:[#allocation3] sm:$0xff] }
 0x377   :  { %347 = vst.msk [vmem:[#allocation5] sm:$0xff] %vm59_vm5, %v346_v60  ;;  %469 = vlog2.f32 %v380_v61 }
 0x37e   :  { %v387_v63 = vld [vmem:[#allocation5] sm:$0xff] }
 0x37f   :  { %471 = vlog2.f32 %v387_v63 }
 0x381   :  { %v470_v62 = vpop.eup %469 }
 0x382   :  { %v382_v0 = vmul.f32 0.6931472, %v470_v62 }
 0x384   :  { %v384_v3 = vadd.f32 %v383_v1, %v382_v0 }
 0x389   :  { %v472_v10 = vpop.eup %471 }
 0x38a   :  { %v389_v11 = vmul.f32 0.6931472, %v472_v10 }
 0x38c   :  { %v391_v12 = vadd.f32 %v390_v8, %v389_v11 }
 0x39c   :  { %v375_v6 = vpop.xlane.xlu1 %374 }
 0x39d   :  { %v385_v9 = vsub.f32 %v384_v3, %v375_v6 }
 0x39f   :  { %386 = vst.msk [vmem:[%s706_s4] sm:$0xff] %vm59_vm5, %v385_v9 }
 0x3a9   :  { %v379_v13 = vpop.xlane.xlu1 %378 }
 0x3aa   :  { %v392_v14 = vsub.f32 %v391_v12, %v379_v13 }
 0x3ac   :  { %393 = vst.msk [vmem:[%s707_s5] sm:$0xff] %vm59_vm5, %v392_v14 }
 0x3ad   :  { %402 = vsyncpa [#allocation7], 1 }
 0x3ae   :  { %403 = vsyncpa [#allocation9], 1 }

</bundles_post_ra>
